<compile_context>
chip_gen: v7x
topology: tpu7x:2x2x1
jax: 0.10.0
libtpu: 0.0.40
codegen_flags: <defaults>
</compile_context>

<pallas_src>
import jax
import jax.numpy as jnp
from jax import lax
from jax.experimental import pallas as pl
from jax.experimental.pallas import tpu as pltpu

# --- config (consistent with Attention(dim=32, num_heads=4)) ---
DIM = 32
NUM_HEADS = 4
HEAD_DIM = DIM // NUM_HEADS            # 8
SCALE = HEAD_DIM ** -0.5
ATTN_DROP = 0.0                        # identity at p=0 / eval mode
PROJ_DROP = 0.0

# Matmul operand dtype.  f32 keeps the 1e-5 in-script reference check; flip to
# jnp.bfloat16 at production sizes (accumulation stays f32, softmax stays f32)
# and the tolerance below loosens automatically.
COMPUTE_DTYPE = jnp.float32


def attention_kernel(x_ref, wq_ref, wk_ref, wv_ref, wp_ref, bproj_ref,
                     o_ref, attn_ref):
    # Per-grid-step (one batch element) block shapes:
    #   x_ref:     (1, N, C)         wq/wk/wv_ref: (H, C, d)     wp_ref: (H, d, C)
    #   bproj_ref: (1, C)            o_ref: (1, N, C)            attn_ref: (1, H, N, N)
    n, c = x_ref.shape[1], x_ref.shape[2]
    x = x_ref[0]                                                       # (N, C)

    acc = jnp.zeros((n, c), dtype=jnp.float32)                         # f32 register accumulator
    for h in range(NUM_HEADS):                                         # static unroll, H=4
        # Per-head Q/K/V straight from per-head weight slabs (no lane slicing of a
        # fused QKV result).  SCALE is already folded into wq in the wrapper.
        qh = jnp.dot(x, wq_ref[h], preferred_element_type=jnp.float32)  # (N, d)
        kh = jnp.dot(x, wk_ref[h], preferred_element_type=jnp.float32)  # (N, d)
        vh = jnp.dot(x, wv_ref[h], preferred_element_type=jnp.float32)  # (N, d)

        # q @ k^T via dot_general contraction on d (MXU handles the transposed RHS).
        logits = lax.dot_general(qh, kh, (((1,), (1,)), ((), ())),
                                 preferred_element_type=jnp.float32)    # (N, N)

        # Softmax in f32 (numerics kept exact; only the divide moves to reciprocal).
        m = jnp.max(logits, axis=-1, keepdims=True)
        p = jnp.exp(logits - m)
        denom = jnp.sum(p, axis=-1, keepdims=True)
        attn_h = p * pl.reciprocal(denom, approx=False)                 # exact: 1e-5 check holds

        # Leading-index block store of the per-head attention map (no mid-lane slicing).
        attn_ref[0, h, :, :] = attn_h.astype(attn_ref.dtype)

        # Context and head's share of the output projection; accumulation on the MXU
        # replaces the old ctx VMEM scratch + reload + 8-lane slice stores.
        ctx_h = jnp.dot(attn_h.astype(COMPUTE_DTYPE), vh.astype(COMPUTE_DTYPE),
                        preferred_element_type=jnp.float32)             # (N, d)
        acc = acc + jnp.dot(ctx_h.astype(COMPUTE_DTYPE), wp_ref[h],
                            preferred_element_type=jnp.float32)         # (N, C)

    # Bias epilogue once, then the single lane-dense (N, C) output store.
    o_ref[0] = (acc + bproj_ref[...]).astype(o_ref.dtype)


def attention_forward(x, w_qkv, w_proj, b_proj):
    """x: [B, N, C] f32.  w_qkv: [3C, C], w_proj: [C, C], b_proj: [C] (PyTorch layouts).

    Returns (out [B, N, C], attn [B, H, N, N]), matching Attention.forward."""
    B, N, C = x.shape
    H, d = NUM_HEADS, HEAD_DIM
    assert C == DIM and C % H == 0

    # --- one-time weight layout plumbing (per-head slabs; scale folded into Q) ---
    wq, wk, wv = w_qkv[:C], w_qkv[C:2 * C], w_qkv[2 * C:]
    wq_h = (wq.reshape(H, d, C) * SCALE).transpose(0, 2, 1).astype(COMPUTE_DTYPE)  # (H, C, d)
    wk_h = wk.reshape(H, d, C).transpose(0, 2, 1).astype(COMPUTE_DTYPE)            # (H, C, d)
    wv_h = wv.reshape(H, d, C).transpose(0, 2, 1).astype(COMPUTE_DTYPE)            # (H, C, d)
    wp_h = w_proj.T.reshape(H, d, C).astype(COMPUTE_DTYPE)                         # (H, d, C)
    bproj = b_proj.reshape(1, C).astype(jnp.float32)
    x_in = x.astype(COMPUTE_DTYPE)

    const3 = lambda b: (0, 0, 0)
    out, attn = pl.pallas_call(
        attention_kernel,
        out_shape=(jax.ShapeDtypeStruct((B, N, C), jnp.float32),
                   jax.ShapeDtypeStruct((B, H, N, N), jnp.float32)),
        grid=(B,),                                   # batch-parallel (uses both TCs on v7x)
        in_specs=[
            pl.BlockSpec((1, N, C), lambda b: (b, 0, 0)),
            pl.BlockSpec((H, C, d), const3),         # constant index map -> fetched once
            pl.BlockSpec((H, C, d), const3),
            pl.BlockSpec((H, C, d), const3),
            pl.BlockSpec((H, d, C), const3),
            pl.BlockSpec((1, C), lambda b: (0, 0)),
        ],
        out_specs=(
            pl.BlockSpec((1, N, C), lambda b: (b, 0, 0)),
            pl.BlockSpec((1, H, N, N), lambda b: (b, 0, 0, 0)),
        ),
        compiler_params=pltpu.CompilerParams(
            dimension_semantics=("parallel",)),
    )(x_in, wq_h, wk_h, wv_h, wp_h, bproj)
    return out, attn


if __name__ == "__main__":
    key = jax.random.PRNGKey(0)
    k_x, k_wqkv, k_wproj, k_bproj = jax.random.split(key, 4)

    B, N = 2, 8
    x = jax.random.normal(k_x, (B, N, DIM), dtype=jnp.float32)

    # nn.Linear-style init (uniform +-1/sqrt(fan_in)); qkv has no bias (qkv_bias=False).
    bound = 1.0 / (DIM ** 0.5)
    w_qkv = jax.random.uniform(k_wqkv, (3 * DIM, DIM), minval=-bound, maxval=bound,
                               dtype=jnp.float32)
    w_proj = jax.random.uniform(k_wproj, (DIM, DIM), minval=-bound, maxval=bound,
                                dtype=jnp.float32)
    b_proj = jax.random.uniform(k_bproj, (DIM,), minval=-bound, maxval=bound,
                                dtype=jnp.float32)

    out, attn = attention_forward(x, w_qkv, w_proj, b_proj)
    out, attn = jax.block_until_ready((out, attn))

    # Plain-JAX reference mirroring the PyTorch forward (f32 matmuls for comparison).
    hp = jax.lax.Precision.HIGHEST
    qkv_r = jnp.einsum('bnc,kc->bnk', x, w_qkv, precision=hp)
    qkv_r = qkv_r.reshape(B, N, 3, NUM_HEADS, HEAD_DIM).transpose(2, 0, 3, 1, 4)
    q_r, k_r, v_r = qkv_r[0], qkv_r[1], qkv_r[2]          # (B, H, N, d)
    q_r = q_r * SCALE
    logits_r = jnp.einsum('bhqd,bhkd->bhqk', q_r, k_r, precision=hp)
    attn_expected = jax.nn.softmax(logits_r, axis=-1)
    ctx_r = jnp.einsum('bhqk,bhkd->bhqd', attn_expected, v_r, precision=hp)
    ctx_r = ctx_r.transpose(0, 2, 1, 3).reshape(B, N, DIM)
    out_expected = jnp.einsum('bnc,kc->bnk', ctx_r, w_proj, precision=hp) + b_proj

    tol = 1e-5 if COMPUTE_DTYPE == jnp.float32 else 3e-2
    assert out.shape == (B, N, DIM) and attn.shape == (B, NUM_HEADS, N, N)
    assert jnp.allclose(out, out_expected, atol=tol, rtol=tol)
    assert jnp.allclose(attn, attn_expected, atol=tol, rtol=tol)

    print("KERNEL_OK")
</pallas_src>

<mosaic_0001>
module attributes {stable_mosaic.version = 11 : i64} {
  func.func @attention_kernel(%arg0: i32, %arg1: memref<1x8x32xf32, #tpu.memory_space<vmem>>, %arg2: memref<4x32x8xf32, #tpu.memory_space<vmem>>, %arg3: memref<4x32x8xf32, #tpu.memory_space<vmem>>, %arg4: memref<4x32x8xf32, #tpu.memory_space<vmem>>, %arg5: memref<4x8x32xf32, #tpu.memory_space<vmem>>, %arg6: memref<1x32xf32, #tpu.memory_space<vmem>>, %arg7: memref<1x8x32xf32, #tpu.memory_space<vmem>>, %arg8: memref<1x4x8x8xf32, #tpu.memory_space<vmem>>) attributes {dimension_semantics = [#tpu.dimension_semantics<parallel>], iteration_bounds = array<i64: 2>, scalar_prefetch = 0 : i64, scratch_operands = 0 : i64, tpu.core_type = #tpu.core_type<tc>, window_params = [{transform_indices = @transform_0, window_bounds = array<i64: 1, 8, 32>}, {pipeline_mode = #tpu.pipeline_mode<synchronous>, transform_indices = @transform_1, window_bounds = array<i64: 4, 32, 8>}, {pipeline_mode = #tpu.pipeline_mode<synchronous>, transform_indices = @transform_2, window_bounds = array<i64: 4, 32, 8>}, {pipeline_mode = #tpu.pipeline_mode<synchronous>, transform_indices = @transform_3, window_bounds = array<i64: 4, 32, 8>}, {pipeline_mode = #tpu.pipeline_mode<synchronous>, transform_indices = @transform_4, window_bounds = array<i64: 4, 8, 32>}, {pipeline_mode = #tpu.pipeline_mode<synchronous>, transform_indices = @transform_5, window_bounds = array<i64: 1, 32>}, {transform_indices = @transform_6, window_bounds = array<i64: 1, 8, 32>}, {transform_indices = @transform_7, window_bounds = array<i64: 1, 4, 8, 8>}]} {
    %c0 = arith.constant 0 : index
    %c0_0 = arith.constant 0 : index
    %c0_1 = arith.constant 0 : index
    %0 = vector.load %arg1[%c0, %c0_0, %c0_1] : memref<1x8x32xf32, #tpu.memory_space<vmem>>, vector<1x8x32xf32>
    %1 = vector.shape_cast %0 : vector<1x8x32xf32> to vector<8x32xf32>
    %cst = arith.constant 0.000000e+00 : f32
    %2 = vector.broadcast %cst : f32 to vector<8x32xf32>
    %c0_2 = arith.constant 0 : index
    %c0_3 = arith.constant 0 : index
    %c0_4 = arith.constant 0 : index
    %3 = vector.load %arg2[%c0_2, %c0_3, %c0_4] : memref<4x32x8xf32, #tpu.memory_space<vmem>>, vector<1x32x8xf32>
    %4 = vector.shape_cast %3 : vector<1x32x8xf32> to vector<32x8xf32>
    %cst_5 = arith.constant dense<0.000000e+00> : vector<8x8xf32>
    %5 = tpu.matmul %1, %4, %cst_5 {dimension_numbers = #tpu.dot_dimension_numbers<[1], [0], [0], [1], [0, 0, 1, 1], [], []>} : vector<8x32xf32>, vector<32x8xf32>, vector<8x8xf32> -> vector<8x8xf32>
    %c0_6 = arith.constant 0 : index
    %c0_7 = arith.constant 0 : index
    %c0_8 = arith.constant 0 : index
    %6 = vector.load %arg3[%c0_6, %c0_7, %c0_8] : memref<4x32x8xf32, #tpu.memory_space<vmem>>, vector<1x32x8xf32>
    %7 = vector.shape_cast %6 : vector<1x32x8xf32> to vector<32x8xf32>
    %cst_9 = arith.constant dense<0.000000e+00> : vector<8x8xf32>
    %8 = tpu.matmul %1, %7, %cst_9 {dimension_numbers = #tpu.dot_dimension_numbers<[1], [0], [0], [1], [0, 0, 1, 1], [], []>} : vector<8x32xf32>, vector<32x8xf32>, vector<8x8xf32> -> vector<8x8xf32>
    %c0_10 = arith.constant 0 : index
    %c0_11 = arith.constant 0 : index
    %c0_12 = arith.constant 0 : index
    %9 = vector.load %arg4[%c0_10, %c0_11, %c0_12] : memref<4x32x8xf32, #tpu.memory_space<vmem>>, vector<1x32x8xf32>
    %10 = vector.shape_cast %9 : vector<1x32x8xf32> to vector<32x8xf32>
    %cst_13 = arith.constant dense<0.000000e+00> : vector<8x8xf32>
    %11 = tpu.matmul %1, %10, %cst_13 {dimension_numbers = #tpu.dot_dimension_numbers<[1], [0], [0], [1], [0, 0, 1, 1], [], []>} : vector<8x32xf32>, vector<32x8xf32>, vector<8x8xf32> -> vector<8x8xf32>
    %cst_14 = arith.constant dense<0.000000e+00> : vector<8x8xf32>
    %12 = tpu.matmul %5, %8, %cst_14 {dimension_numbers = #tpu.dot_dimension_numbers<[1], [1], [0], [0], [0, 0, 1, 0], [], []>} : vector<8x8xf32>, vector<8x8xf32>, vector<8x8xf32> -> vector<8x8xf32>
    %cst_15 = arith.constant dense<0xFF800000> : vector<8xf32>
    %13 = vector.multi_reduction <maximumf>, %12, %cst_15 [1] : vector<8x8xf32> to vector<8xf32>
    %14 = vector.shape_cast %13 : vector<8xf32> to vector<8x1xf32>
    %15 = vector.broadcast %14 : vector<8x1xf32> to vector<8x8xf32>
    %16 = arith.subf %12, %15 : vector<8x8xf32>
    %17 = math.exp %16 : vector<8x8xf32>
    %cst_16 = arith.constant dense<0.000000e+00> : vector<8xf32>
    %18 = vector.multi_reduction <add>, %17, %cst_16 [1] : vector<8x8xf32> to vector<8xf32>
    %19 = vector.shape_cast %18 : vector<8xf32> to vector<8x1xf32>
    %20 = tpu.reciprocal %19 : vector<8x1xf32> -> vector<8x1xf32>
    %21 = vector.broadcast %20 : vector<8x1xf32> to vector<8x8xf32>
    %22 = arith.mulf %17, %21 : vector<8x8xf32>
    %c0_17 = arith.constant 0 : index
    %c0_18 = arith.constant 0 : index
    %c0_19 = arith.constant 0 : index
    %c0_20 = arith.constant 0 : index
    %23 = vector.load %arg8[%c0_17, %c0_18, %c0_19, %c0_20] : memref<1x4x8x8xf32, #tpu.memory_space<vmem>>, vector<1x1x8x8xf32>
    %24 = vector.shape_cast %23 : vector<1x1x8x8xf32> to vector<8x8xf32>
    %25 = vector.shape_cast %22 : vector<8x8xf32> to vector<1x1x8x8xf32>
    tpu.vector_store %arg8[%c0_17, %c0_18, %c0_19, %c0_20], %25 {strides = array<i32>} : memref<1x4x8x8xf32, #tpu.memory_space<vmem>>, vector<1x1x8x8xf32>,
    %cst_21 = arith.constant dense<0.000000e+00> : vector<8x8xf32>
    %26 = tpu.matmul %22, %11, %cst_21 {dimension_numbers = #tpu.dot_dimension_numbers<[1], [0], [0], [1], [0, 0, 1, 1], [], []>} : vector<8x8xf32>, vector<8x8xf32>, vector<8x8xf32> -> vector<8x8xf32>
    %c0_22 = arith.constant 0 : index
    %c0_23 = arith.constant 0 : index
    %c0_24 = arith.constant 0 : index
    %27 = vector.load %arg5[%c0_22, %c0_23, %c0_24] : memref<4x8x32xf32, #tpu.memory_space<vmem>>, vector<1x8x32xf32>
    %28 = vector.shape_cast %27 : vector<1x8x32xf32> to vector<8x32xf32>
    %cst_25 = arith.constant dense<0.000000e+00> : vector<8x32xf32>
    %29 = tpu.matmul %26, %28, %cst_25 {dimension_numbers = #tpu.dot_dimension_numbers<[1], [0], [0], [1], [0, 0, 1, 1], [], []>} : vector<8x8xf32>, vector<8x32xf32>, vector<8x32xf32> -> vector<8x32xf32>
    %30 = arith.addf %2, %29 : vector<8x32xf32>
    %c1 = arith.constant 1 : index
    %c0_26 = arith.constant 0 : index
    %c0_27 = arith.constant 0 : index
    %31 = vector.load %arg2[%c1, %c0_26, %c0_27] : memref<4x32x8xf32, #tpu.memory_space<vmem>>, vector<1x32x8xf32>
    %32 = vector.shape_cast %31 : vector<1x32x8xf32> to vector<32x8xf32>
    %cst_28 = arith.constant dense<0.000000e+00> : vector<8x8xf32>
    %33 = tpu.matmul %1, %32, %cst_28 {dimension_numbers = #tpu.dot_dimension_numbers<[1], [0], [0], [1], [0, 0, 1, 1], [], []>} : vector<8x32xf32>, vector<32x8xf32>, vector<8x8xf32> -> vector<8x8xf32>
    %c1_29 = arith.constant 1 : index
    %c0_30 = arith.constant 0 : index
    %c0_31 = arith.constant 0 : index
    %34 = vector.load %arg3[%c1_29, %c0_30, %c0_31] : memref<4x32x8xf32, #tpu.memory_space<vmem>>, vector<1x32x8xf32>
    %35 = vector.shape_cast %34 : vector<1x32x8xf32> to vector<32x8xf32>
    %cst_32 = arith.constant dense<0.000000e+00> : vector<8x8xf32>
    %36 = tpu.matmul %1, %35, %cst_32 {dimension_numbers = #tpu.dot_dimension_numbers<[1], [0], [0], [1], [0, 0, 1, 1], [], []>} : vector<8x32xf32>, vector<32x8xf32>, vector<8x8xf32> -> vector<8x8xf32>
    %c1_33 = arith.constant 1 : index
    %c0_34 = arith.constant 0 : index
    %c0_35 = arith.constant 0 : index
    %37 = vector.load %arg4[%c1_33, %c0_34, %c0_35] : memref<4x32x8xf32, #tpu.memory_space<vmem>>, vector<1x32x8xf32>
    %38 = vector.shape_cast %37 : vector<1x32x8xf32> to vector<32x8xf32>
    %cst_36 = arith.constant dense<0.000000e+00> : vector<8x8xf32>
    %39 = tpu.matmul %1, %38, %cst_36 {dimension_numbers = #tpu.dot_dimension_numbers<[1], [0], [0], [1], [0, 0, 1, 1], [], []>} : vector<8x32xf32>, vector<32x8xf32>, vector<8x8xf32> -> vector<8x8xf32>
    %cst_37 = arith.constant dense<0.000000e+00> : vector<8x8xf32>
    %40 = tpu.matmul %33, %36, %cst_37 {dimension_numbers = #tpu.dot_dimension_numbers<[1], [1], [0], [0], [0, 0, 1, 0], [], []>} : vector<8x8xf32>, vector<8x8xf32>, vector<8x8xf32> -> vector<8x8xf32>
    %cst_38 = arith.constant dense<0xFF800000> : vector<8xf32>
    %41 = vector.multi_reduction <maximumf>, %40, %cst_38 [1] : vector<8x8xf32> to vector<8xf32>
    %42 = vector.shape_cast %41 : vector<8xf32> to vector<8x1xf32>
    %43 = vector.broadcast %42 : vector<8x1xf32> to vector<8x8xf32>
    %44 = arith.subf %40, %43 : vector<8x8xf32>
    %45 = math.exp %44 : vector<8x8xf32>
    %cst_39 = arith.constant dense<0.000000e+00> : vector<8xf32>
    %46 = vector.multi_reduction <add>, %45, %cst_39 [1] : vector<8x8xf32> to vector<8xf32>
    %47 = vector.shape_cast %46 : vector<8xf32> to vector<8x1xf32>
    %48 = tpu.reciprocal %47 : vector<8x1xf32> -> vector<8x1xf32>
    %49 = vector.broadcast %48 : vector<8x1xf32> to vector<8x8xf32>
    %50 = arith.mulf %45, %49 : vector<8x8xf32>
    %c0_40 = arith.constant 0 : index
    %c1_41 = arith.constant 1 : index
    %c0_42 = arith.constant 0 : index
    %c0_43 = arith.constant 0 : index
    %51 = vector.load %arg8[%c0_40, %c1_41, %c0_42, %c0_43] : memref<1x4x8x8xf32, #tpu.memory_space<vmem>>, vector<1x1x8x8xf32>
    %52 = vector.shape_cast %51 : vector<1x1x8x8xf32> to vector<8x8xf32>
    %53 = vector.shape_cast %50 : vector<8x8xf32> to vector<1x1x8x8xf32>
    tpu.vector_store %arg8[%c0_40, %c1_41, %c0_42, %c0_43], %53 {strides = array<i32>} : memref<1x4x8x8xf32, #tpu.memory_space<vmem>>, vector<1x1x8x8xf32>,
    %cst_44 = arith.constant dense<0.000000e+00> : vector<8x8xf32>
    %54 = tpu.matmul %50, %39, %cst_44 {dimension_numbers = #tpu.dot_dimension_numbers<[1], [0], [0], [1], [0, 0, 1, 1], [], []>} : vector<8x8xf32>, vector<8x8xf32>, vector<8x8xf32> -> vector<8x8xf32>
    %c1_45 = arith.constant 1 : index
    %c0_46 = arith.constant 0 : index
    %c0_47 = arith.constant 0 : index
    %55 = vector.load %arg5[%c1_45, %c0_46, %c0_47] : memref<4x8x32xf32, #tpu.memory_space<vmem>>, vector<1x8x32xf32>
    %56 = vector.shape_cast %55 : vector<1x8x32xf32> to vector<8x32xf32>
    %cst_48 = arith.constant dense<0.000000e+00> : vector<8x32xf32>
    %57 = tpu.matmul %54, %56, %cst_48 {dimension_numbers = #tpu.dot_dimension_numbers<[1], [0], [0], [1], [0, 0, 1, 1], [], []>} : vector<8x8xf32>, vector<8x32xf32>, vector<8x32xf32> -> vector<8x32xf32>
    %58 = arith.addf %30, %57 : vector<8x32xf32>
    %c2 = arith.constant 2 : index
    %c0_49 = arith.constant 0 : index
    %c0_50 = arith.constant 0 : index
    %59 = vector.load %arg2[%c2, %c0_49, %c0_50] : memref<4x32x8xf32, #tpu.memory_space<vmem>>, vector<1x32x8xf32>
    %60 = vector.shape_cast %59 : vector<1x32x8xf32> to vector<32x8xf32>
    %cst_51 = arith.constant dense<0.000000e+00> : vector<8x8xf32>
    %61 = tpu.matmul %1, %60, %cst_51 {dimension_numbers = #tpu.dot_dimension_numbers<[1], [0], [0], [1], [0, 0, 1, 1], [], []>} : vector<8x32xf32>, vector<32x8xf32>, vector<8x8xf32> -> vector<8x8xf32>
    %c2_52 = arith.constant 2 : index
    %c0_53 = arith.constant 0 : index
    %c0_54 = arith.constant 0 : index
    %62 = vector.load %arg3[%c2_52, %c0_53, %c0_54] : memref<4x32x8xf32, #tpu.memory_space<vmem>>, vector<1x32x8xf32>
    %63 = vector.shape_cast %62 : vector<1x32x8xf32> to vector<32x8xf32>
    %cst_55 = arith.constant dense<0.000000e+00> : vector<8x8xf32>
    %64 = tpu.matmul %1, %63, %cst_55 {dimension_numbers = #tpu.dot_dimension_numbers<[1], [0], [0], [1], [0, 0, 1, 1], [], []>} : vector<8x32xf32>, vector<32x8xf32>, vector<8x8xf32> -> vector<8x8xf32>
    %c2_56 = arith.constant 2 : index
    %c0_57 = arith.constant 0 : index
    %c0_58 = arith.constant 0 : index
    %65 = vector.load %arg4[%c2_56, %c0_57, %c0_58] : memref<4x32x8xf32, #tpu.memory_space<vmem>>, vector<1x32x8xf32>
    %66 = vector.shape_cast %65 : vector<1x32x8xf32> to vector<32x8xf32>
    %cst_59 = arith.constant dense<0.000000e+00> : vector<8x8xf32>
    %67 = tpu.matmul %1, %66, %cst_59 {dimension_numbers = #tpu.dot_dimension_numbers<[1], [0], [0], [1], [0, 0, 1, 1], [], []>} : vector<8x32xf32>, vector<32x8xf32>, vector<8x8xf32> -> vector<8x8xf32>
    %cst_60 = arith.constant dense<0.000000e+00> : vector<8x8xf32>
    %68 = tpu.matmul %61, %64, %cst_60 {dimension_numbers = #tpu.dot_dimension_numbers<[1], [1], [0], [0], [0, 0, 1, 0], [], []>} : vector<8x8xf32>, vector<8x8xf32>, vector<8x8xf32> -> vector<8x8xf32>
    %cst_61 = arith.constant dense<0xFF800000> : vector<8xf32>
    %69 = vector.multi_reduction <maximumf>, %68, %cst_61 [1] : vector<8x8xf32> to vector<8xf32>
    %70 = vector.shape_cast %69 : vector<8xf32> to vector<8x1xf32>
    %71 = vector.broadcast %70 : vector<8x1xf32> to vector<8x8xf32>
    %72 = arith.subf %68, %71 : vector<8x8xf32>
    %73 = math.exp %72 : vector<8x8xf32>
    %cst_62 = arith.constant dense<0.000000e+00> : vector<8xf32>
    %74 = vector.multi_reduction <add>, %73, %cst_62 [1] : vector<8x8xf32> to vector<8xf32>
    %75 = vector.shape_cast %74 : vector<8xf32> to vector<8x1xf32>
    %76 = tpu.reciprocal %75 : vector<8x1xf32> -> vector<8x1xf32>
    %77 = vector.broadcast %76 : vector<8x1xf32> to vector<8x8xf32>
    %78 = arith.mulf %73, %77 : vector<8x8xf32>
    %c0_63 = arith.constant 0 : index
    %c2_64 = arith.constant 2 : index
    %c0_65 = arith.constant 0 : index
    %c0_66 = arith.constant 0 : index
    %79 = vector.load %arg8[%c0_63, %c2_64, %c0_65, %c0_66] : memref<1x4x8x8xf32, #tpu.memory_space<vmem>>, vector<1x1x8x8xf32>
    %80 = vector.shape_cast %79 : vector<1x1x8x8xf32> to vector<8x8xf32>
    %81 = vector.shape_cast %78 : vector<8x8xf32> to vector<1x1x8x8xf32>
    tpu.vector_store %arg8[%c0_63, %c2_64, %c0_65, %c0_66], %81 {strides = array<i32>} : memref<1x4x8x8xf32, #tpu.memory_space<vmem>>, vector<1x1x8x8xf32>,
    %cst_67 = arith.constant dense<0.000000e+00> : vector<8x8xf32>
    %82 = tpu.matmul %78, %67, %cst_67 {dimension_numbers = #tpu.dot_dimension_numbers<[1], [0], [0], [1], [0, 0, 1, 1], [], []>} : vector<8x8xf32>, vector<8x8xf32>, vector<8x8xf32> -> vector<8x8xf32>
    %c2_68 = arith.constant 2 : index
    %c0_69 = arith.constant 0 : index
    %c0_70 = arith.constant 0 : index
    %83 = vector.load %arg5[%c2_68, %c0_69, %c0_70] : memref<4x8x32xf32, #tpu.memory_space<vmem>>, vector<1x8x32xf32>
    %84 = vector.shape_cast %83 : vector<1x8x32xf32> to vector<8x32xf32>
    %cst_71 = arith.constant dense<0.000000e+00> : vector<8x32xf32>
    %85 = tpu.matmul %82, %84, %cst_71 {dimension_numbers = #tpu.dot_dimension_numbers<[1], [0], [0], [1], [0, 0, 1, 1], [], []>} : vector<8x8xf32>, vector<8x32xf32>, vector<8x32xf32> -> vector<8x32xf32>
    %86 = arith.addf %58, %85 : vector<8x32xf32>
    %c3 = arith.constant 3 : index
    %c0_72 = arith.constant 0 : index
    %c0_73 = arith.constant 0 : index
    %87 = vector.load %arg2[%c3, %c0_72, %c0_73] : memref<4x32x8xf32, #tpu.memory_space<vmem>>, vector<1x32x8xf32>
    %88 = vector.shape_cast %87 : vector<1x32x8xf32> to vector<32x8xf32>
    %cst_74 = arith.constant dense<0.000000e+00> : vector<8x8xf32>
    %89 = tpu.matmul %1, %88, %cst_74 {dimension_numbers = #tpu.dot_dimension_numbers<[1], [0], [0], [1], [0, 0, 1, 1], [], []>} : vector<8x32xf32>, vector<32x8xf32>, vector<8x8xf32> -> vector<8x8xf32>
    %c3_75 = arith.constant 3 : index
    %c0_76 = arith.constant 0 : index
    %c0_77 = arith.constant 0 : index
    %90 = vector.load %arg3[%c3_75, %c0_76, %c0_77] : memref<4x32x8xf32, #tpu.memory_space<vmem>>, vector<1x32x8xf32>
    %91 = vector.shape_cast %90 : vector<1x32x8xf32> to vector<32x8xf32>
    %cst_78 = arith.constant dense<0.000000e+00> : vector<8x8xf32>
    %92 = tpu.matmul %1, %91, %cst_78 {dimension_numbers = #tpu.dot_dimension_numbers<[1], [0], [0], [1], [0, 0, 1, 1], [], []>} : vector<8x32xf32>, vector<32x8xf32>, vector<8x8xf32> -> vector<8x8xf32>
    %c3_79 = arith.constant 3 : index
    %c0_80 = arith.constant 0 : index
    %c0_81 = arith.constant 0 : index
    %93 = vector.load %arg4[%c3_79, %c0_80, %c0_81] : memref<4x32x8xf32, #tpu.memory_space<vmem>>, vector<1x32x8xf32>
    %94 = vector.shape_cast %93 : vector<1x32x8xf32> to vector<32x8xf32>
    %cst_82 = arith.constant dense<0.000000e+00> : vector<8x8xf32>
    %95 = tpu.matmul %1, %94, %cst_82 {dimension_numbers = #tpu.dot_dimension_numbers<[1], [0], [0], [1], [0, 0, 1, 1], [], []>} : vector<8x32xf32>, vector<32x8xf32>, vector<8x8xf32> -> vector<8x8xf32>
    %cst_83 = arith.constant dense<0.000000e+00> : vector<8x8xf32>
    %96 = tpu.matmul %89, %92, %cst_83 {dimension_numbers = #tpu.dot_dimension_numbers<[1], [1], [0], [0], [0, 0, 1, 0], [], []>} : vector<8x8xf32>, vector<8x8xf32>, vector<8x8xf32> -> vector<8x8xf32>
    %cst_84 = arith.constant dense<0xFF800000> : vector<8xf32>
    %97 = vector.multi_reduction <maximumf>, %96, %cst_84 [1] : vector<8x8xf32> to vector<8xf32>
    %98 = vector.shape_cast %97 : vector<8xf32> to vector<8x1xf32>
    %99 = vector.broadcast %98 : vector<8x1xf32> to vector<8x8xf32>
    %100 = arith.subf %96, %99 : vector<8x8xf32>
    %101 = math.exp %100 : vector<8x8xf32>
    %cst_85 = arith.constant dense<0.000000e+00> : vector<8xf32>
    %102 = vector.multi_reduction <add>, %101, %cst_85 [1] : vector<8x8xf32> to vector<8xf32>
    %103 = vector.shape_cast %102 : vector<8xf32> to vector<8x1xf32>
    %104 = tpu.reciprocal %103 : vector<8x1xf32> -> vector<8x1xf32>
    %105 = vector.broadcast %104 : vector<8x1xf32> to vector<8x8xf32>
    %106 = arith.mulf %101, %105 : vector<8x8xf32>
    %c0_86 = arith.constant 0 : index
    %c3_87 = arith.constant 3 : index
    %c0_88 = arith.constant 0 : index
    %c0_89 = arith.constant 0 : index
    %107 = vector.load %arg8[%c0_86, %c3_87, %c0_88, %c0_89] : memref<1x4x8x8xf32, #tpu.memory_space<vmem>>, vector<1x1x8x8xf32>
    %108 = vector.shape_cast %107 : vector<1x1x8x8xf32> to vector<8x8xf32>
    %109 = vector.shape_cast %106 : vector<8x8xf32> to vector<1x1x8x8xf32>
    tpu.vector_store %arg8[%c0_86, %c3_87, %c0_88, %c0_89], %109 {strides = array<i32>} : memref<1x4x8x8xf32, #tpu.memory_space<vmem>>, vector<1x1x8x8xf32>,
    %cst_90 = arith.constant dense<0.000000e+00> : vector<8x8xf32>
    %110 = tpu.matmul %106, %95, %cst_90 {dimension_numbers = #tpu.dot_dimension_numbers<[1], [0], [0], [1], [0, 0, 1, 1], [], []>} : vector<8x8xf32>, vector<8x8xf32>, vector<8x8xf32> -> vector<8x8xf32>
    %c3_91 = arith.constant 3 : index
    %c0_92 = arith.constant 0 : index
    %c0_93 = arith.constant 0 : index
    %111 = vector.load %arg5[%c3_91, %c0_92, %c0_93] : memref<4x8x32xf32, #tpu.memory_space<vmem>>, vector<1x8x32xf32>
    %112 = vector.shape_cast %111 : vector<1x8x32xf32> to vector<8x32xf32>
    %cst_94 = arith.constant dense<0.000000e+00> : vector<8x32xf32>
    %113 = tpu.matmul %110, %112, %cst_94 {dimension_numbers = #tpu.dot_dimension_numbers<[1], [0], [0], [1], [0, 0, 1, 1], [], []>} : vector<8x8xf32>, vector<8x32xf32>, vector<8x32xf32> -> vector<8x32xf32>
    %114 = arith.addf %86, %113 : vector<8x32xf32>
    %c0_95 = arith.constant 0 : index
    %c0_96 = arith.constant 0 : index
    %115 = vector.load %arg6[%c0_95, %c0_96] : memref<1x32xf32, #tpu.memory_space<vmem>>, vector<1x32xf32>
    %116 = vector.broadcast %115 : vector<1x32xf32> to vector<8x32xf32>
    %117 = arith.addf %114, %116 : vector<8x32xf32>
    %c0_97 = arith.constant 0 : index
    %c0_98 = arith.constant 0 : index
    %c0_99 = arith.constant 0 : index
    %118 = vector.load %arg7[%c0_97, %c0_98, %c0_99] : memref<1x8x32xf32, #tpu.memory_space<vmem>>, vector<1x8x32xf32>
    %119 = vector.shape_cast %118 : vector<1x8x32xf32> to vector<8x32xf32>
    %120 = vector.shape_cast %117 : vector<8x32xf32> to vector<1x8x32xf32>
    tpu.vector_store %arg7[%c0_97, %c0_98, %c0_99], %120 {strides = array<i32>} : memref<1x8x32xf32, #tpu.memory_space<vmem>>, vector<1x8x32xf32>,
    return
  }
  func.func @transform_0(%arg0: i32) -> (i32, i32, i32) {
    %c0_i32 = arith.constant 0 : i32
    %c0_i32_0 = arith.constant 0 : i32
    %c0_i32_1 = arith.constant 0 : i32
    return %arg0, %c0_i32, %c0_i32_0 : i32, i32, i32
  }
  func.func @transform_1(%arg0: i32) -> (i32, i32, i32) {
    %c0_i32 = arith.constant 0 : i32
    %c0_i32_0 = arith.constant 0 : i32
    %c0_i32_1 = arith.constant 0 : i32
    %c0_i32_2 = arith.constant 0 : i32
    return %c0_i32, %c0_i32_0, %c0_i32_1 : i32, i32, i32
  }
  func.func @transform_2(%arg0: i32) -> (i32, i32, i32) {
    %c0_i32 = arith.constant 0 : i32
    %c0_i32_0 = arith.constant 0 : i32
    %c0_i32_1 = arith.constant 0 : i32
    %c0_i32_2 = arith.constant 0 : i32
    return %c0_i32, %c0_i32_0, %c0_i32_1 : i32, i32, i32
  }
  func.func @transform_3(%arg0: i32) -> (i32, i32, i32) {
    %c0_i32 = arith.constant 0 : i32
    %c0_i32_0 = arith.constant 0 : i32
    %c0_i32_1 = arith.constant 0 : i32
    %c0_i32_2 = arith.constant 0 : i32
    return %c0_i32, %c0_i32_0, %c0_i32_1 : i32, i32, i32
  }
  func.func @transform_4(%arg0: i32) -> (i32, i32, i32) {
    %c0_i32 = arith.constant 0 : i32
    %c0_i32_0 = arith.constant 0 : i32
    %c0_i32_1 = arith.constant 0 : i32
    %c0_i32_2 = arith.constant 0 : i32
    return %c0_i32, %c0_i32_0, %c0_i32_1 : i32, i32, i32
  }
  func.func @transform_5(%arg0: i32) -> (i32, i32) {
    %c0_i32 = arith.constant 0 : i32
    %c0_i32_0 = arith.constant 0 : i32
    %c0_i32_1 = arith.constant 0 : i32
    return %c0_i32, %c0_i32_0 : i32, i32
  }
  func.func @transform_6(%arg0: i32) -> (i32, i32, i32) {
    %c0_i32 = arith.constant 0 : i32
    %c0_i32_0 = arith.constant 0 : i32
    %c0_i32_1 = arith.constant 0 : i32
    return %arg0, %c0_i32, %c0_i32_0 : i32, i32, i32
  }
  func.func @transform_7(%arg0: i32) -> (i32, i32, i32, i32) {
    %c0_i32 = arith.constant 0 : i32
    %c0_i32_0 = arith.constant 0 : i32
    %c0_i32_1 = arith.constant 0 : i32
    %c0_i32_2 = arith.constant 0 : i32
    return %arg0, %c0_i32, %c0_i32_0, %c0_i32_1 : i32, i32, i32, i32
  }
}

</mosaic_0001>

<bundles_post_ra>
// kernel: tpu_custom_call.1
= control target key start
LH: loop header
LB: loop body
LE: loop exit
PB: predicated region body
PF: predicated region fallthrough
CT: control target
= control target key end

     0   :  { %s3361_s0 = inlined_call_operand.vmem [shape: f32[2,8,32], index: 0, kind: input, shape index: {}]   ;;  %s3362_s1 = inlined_call_operand.vmem [shape: f32[4,32,8], index: 1, kind: input, shape index: {}]   ;;  %s3363_s2 = inlined_call_operand.vmem [shape: f32[4,32,8], index: 2, kind: input, shape index: {}]   ;;  %s3364_s3 = inlined_call_operand.vmem [shape: f32[4,32,8], index: 3, kind: input, shape index: {}]   ;;  %s3365_s4 = inlined_call_operand.vmem [shape: f32[4,8,32], index: 4, kind: input, shape index: {}]   ;;  %s3366_s5 = inlined_call_operand.vmem [shape: f32[1,32], index: 5, kind: input, shape index: {}]   ;;  %s3367_s6 = inlined_call_operand.hbm [shape: f32[2,8,32], index: 6, kind: output, shape index: {0}]   ;;  %s3368_s7 = inlined_call_operand.hbm [shape: f32[2,4,8,8], index: 7, kind: output, shape index: {1}]  }
   0x1   :  { %3369 = sst [smem:[#allocation8_spill]] %s3361_s0 }
   0x2   :  { %13 = vsyncpa [#allocation3], 0 }
   0x3   :  { %15 = vsyncpa [#allocation3 + $0x1], 0 }
   0x4   :  { %16 = vsyncpa [#allocation5], 0 }
   0x5   :  { %18 = vsyncpa [#allocation5 + $0x1], 0  ;;  %s2913_s24 = smov 0   ;;  %s2915_s25 = smov 0  }
   0x6   :  { %s2917_s26 = smov 0   ;;  %s2919_s27 = smov 0  }
   0x7 LB: > { %s2934_s28 = sadd.s32 4294967295, %s2864_s27   ;;  %s2271_s29 = sadd.s32 4294967294, %s2864_s27   ;;  %s2864_s27 = sphi %s2919_s27, %s3376_s27   ;;  %s2860_s26 = sphi %s2917_s26, %s3375_s26   ;;  %s2856_s25 = sphi %s2915_s25, %s3374_s25   ;;  %s2852_s24 = sphi %s2913_s24, %s3373_s24  }
   0x8   : > { %s2938_s30 = sadd.s32 1, %s2864_s27   ;;  %s162_s8 = sadd.s32 1, %s2860_s26 }
   0x9   : > { %s159_s9 = ssub.s32 %s2864_s27, %s2938_s30  ;;  %p172_p0 = scmp.ne.s32.totalorder %s2860_s26, %s2856_s25 }
   0xa   : > { %p160_p1 = scmp.eq.s32.totalorder %s159_s9, 0  ;;  %p173_p2 = scmp.eq.s32.totalorder %s2934_s28, 1 }
   0xb   : > { %p178_p3 = scmp.ne.s32.totalorder %s2856_s25, %s2852_s24  ;;  %p179_p4 = scmp.eq.s32.totalorder %s2271_s29, 1 }
   0xc   : > { %s2949_s10 = scalar_select %p160_p1, %s2860_s26, %s162_s8  }
   0xd   : > { %p2951_p5 = por %p173_p2, %p172_p0  ;;  %p2955_p6 = por %p179_p4, %p178_p3 }
   0xe   : > { %p2274_p7 = scmp.ge.s32.totalorder %s2864_s27, 1  ;;  %p245_p8 = scmp.lt.s32.totalorder %s2864_s27, 3 }
  0x10   : > { %p246_p9 = pnand %p2274_p7, %p245_p8 }
  0x11   : > { %v364_v0 = vld [vmem:[%s3363_s2] sm:$0xff] (!%p246_p9)  ;;  %v365_v1 = vld [vmem:[%s3363_s2 + $0x8] sm:$0xff] (!%p246_p9)  ;;  %v2866_v3 = vmov (!%p246_p9), 0.0|0.0   ;;  %v366_v6 = vld [vmem:[%s3363_s2 + $0x10] sm:$0xff] (!%p246_p9)  ;;  %p281_p10 = scmp.lt.s32.totalorder (!%p246_p9), %s2934_s28, 1  ;;  %vm2867_vm0 = vmmov (!%p246_p9), 0  }
  0x12   : > { %249 = sbr.rel (%p246_p9) target bundleno = 3881 (0xf29), region = 44  ;;  %v286_v2 = vld [vmem:[%s3362_s1] sm:$0xff] (!%p246_p9)  ;;  %2639 = vmatprep.subr.bf16.mxu1 (!%p246_p9), %v2866_v3  ;;  %v2640_v4 = vpack.c.bf16 (!%p246_p9), %v365_v1, %v364_v0  ;;  %2633 = vmatprep.subr.bf16.mxu0 (!%p246_p9), %v2866_v3  ;;  %v287_v5 = vld [vmem:[%s3362_s1 + $0x8] sm:$0xff] (!%p246_p9)  ;;  %v367_v7 = vld [vmem:[%s3363_s2 + $0x18] sm:$0xff] (!%p246_p9)  ;;  %v2868_v11 = vmov (!%p246_p9), 0.0   ;;  %s3372_s0 = sld [smem:[#allocation8_spill]] (!%p246_p9) }
  0x13   : > { %v2634_v8 = vpack.c.bf16 (!%p246_p9), %v287_v5, %v286_v2  ;;  %v288_v9 = vld [vmem:[%s3362_s1 + $0x10] sm:$0xff] (!%p246_p9)  ;;  %v289_v10 = vld [vmem:[%s3362_s1 + $0x18] sm:$0xff] (!%p246_p9)  ;;  %2460 = vmatprep.mubr.msk.f32.mxu1 (!%p246_p9), %vm2867_vm0, %v2868_v11  ;;  %2449 = vmatprep.mubr.msk.f32.mxu0 (!%p246_p9), %vm2867_vm0, %v2868_v11  ;;  %v2643_v12 = vpack.c.bf16 (!%p246_p9), %v367_v7, %v366_v6  ;;  %vm290_vm1 = vcmask (!%p246_p9), 261120   ;;  %vm512_vm2 = vcmask (!%p246_p9), 64512   ;;  %v438_v19 = vld [vmem:[%s3364_s3] sm:$0xff] (!%p246_p9)  ;;  %s3055_s22 = sand.u32 (!%p246_p9), 1, %s2856_s25  }
  0x14   : > { %2641 = vmatpush3.bf16.msra.mxu1 (!%p246_p9), %v2640_v4  ;;  %v2637_v13 = vpack.c.bf16 (!%p246_p9), %v289_v10, %v288_v9  ;;  %v439_v20 = vld [vmem:[%s3364_s3 + $0x8] sm:$0xff] (!%p246_p9)  ;;  %v440_v21 = vld [vmem:[%s3364_s3 + $0x10] sm:$0xff] (!%p246_p9)  ;;  %v441_v23 = vld [vmem:[%s3364_s3 + $0x18] sm:$0xff] (!%p246_p9)  ;;  %s2276_s13 = sshll.u32 (!%p246_p9), %s3055_s22, 5  ;;  %s2356_s8 = sshll.u32 (!%p246_p9), %s2934_s28, 9 }
  0x15   : > { %2635 = vmatpush3.bf16.msra.mxu0 (!%p246_p9), %v2634_v8  ;;  %2642 = vmatprep.subr.bf16.mxu1 (!%p246_p9), %v2866_v3  ;;  %v2646_v22 = vpack.c.bf16 (!%p246_p9), %v439_v20, %v438_v19  ;;  %v2649_v24 = vpack.c.bf16 (!%p246_p9), %v441_v23, %v440_v21  ;;  %v2284_v35 = vld [vmem:[%s3362_s1 + $0x20] sm:$0xff] (!%p246_p9)  ;;  %v2285_v36 = vld [vmem:[%s3362_s1 + $0x28] sm:$0xff] (!%p246_p9)  ;;  %v2286_v38 = vld [vmem:[%s3362_s1 + $0x30] sm:$0xff] (!%p246_p9)  ;;  %s3071_s18 = scalar_lea.vmem (!%p246_p9), [#allocation4], %s2276_s13  ;;  %s3282_s14 = scalar_lea.hbm (!%p246_p9), %s3368_s7, %s2356_s8 }
  0x16   : > { %2636 = vmatprep.subr.bf16.mxu0 (!%p246_p9), %v2866_v3  ;;  %v2652_v37 = vpack.c.bf16 (!%p246_p9), %v2285_v36, %v2284_v35  ;;  %v2287_v39 = vld [vmem:[%s3362_s1 + $0x38] sm:$0xff] (!%p246_p9)  ;;  %v2289_v42 = vld [vmem:[%s3363_s2 + $0x20] sm:$0xff] (!%p246_p9)  ;;  %v2290_v43 = vld [vmem:[%s3363_s2 + $0x28] sm:$0xff] (!%p246_p9)  ;;  %s2177_s29 = sshll.u32 (!%p246_p9), %s3071_s18, 4  ;;  %s2869_s17 = smov (!%p246_p9), [#allocation4]   ;;  %s3277_s29 = int_to_ptr.vmem [resolvable:$true] %s2177_s29 }
  0x17   : > { %v2655_v40 = vpack.c.bf16 (!%p246_p9), %v2287_v39, %v2286_v38  ;;  %v2658_v45 = vpack.c.bf16 (!%p246_p9), %v2290_v43, %v2289_v42  ;;  %v2291_v47 = vld [vmem:[%s3363_s2 + $0x30] sm:$0xff] (!%p246_p9)  ;;  %v2292_v48 = vld [vmem:[%s3363_s2 + $0x38] sm:$0xff] (!%p246_p9)  ;;  %v2294_v56 = vld [vmem:[%s3364_s3 + $0x20] sm:$0xff] (!%p246_p9) }
  0x18   : > { %2644 = vmatpush3.bf16.msra.mxu1 (!%p246_p9), %v2643_v12  ;;  %v2661_v49 = vpack.c.bf16 (!%p246_p9), %v2292_v48, %v2291_v47  ;;  %v2295_v57 = vld [vmem:[%s3364_s3 + $0x28] sm:$0xff] (!%p246_p9)  ;;  %v2296_v58 = vld [vmem:[%s3364_s3 + $0x30] sm:$0xff] (!%p246_p9)  ;;  %v2297_v60 = vld [vmem:[%s3364_s3 + $0x38] sm:$0xff] (!%p246_p9) }
  0x19   : > { %s282_s15 = scalar_select %p281_p10, %s2934_s28, 1  ;;  %2638 = vmatpush3.bf16.msra.mxu0 %v2637_v13  ;;  %2474 = vmatprep.subr.mxu1 %v2868_v11  ;;  %v2664_v59 = vpack.c.bf16 %v2295_v57, %v2294_v56  ;;  %v2667_v61 = vpack.c.bf16 %v2297_v60, %v2296_v58  ;;  %v2303_v9 = vld [vmem:[%s3365_s4 + $0x8] sm:$0xff]  ;;  %v2313_v19 = vld [vmem:[%s3363_s2 + $0x50] sm:$0xff]  ;;  %v2314_v20 = vld [vmem:[%s3363_s2 + $0x58] sm:$0xff] }
  0x1a   : > { %2645 = vmatprep.subr.bf16.mxu0 %v2866_v3  ;;  %v2679_v21 = vpack.c.bf16 %v2314_v20, %v2313_v19  ;;  %v2307_v23 = vld [vmem:[%s3362_s1 + $0x48] sm:$0xff]  ;;  %v2316_v39 = vld [vmem:[%s3364_s3 + $0x40] sm:$0xff]  ;;  %v2319_v43 = vld [vmem:[%s3364_s3 + $0x58] sm:$0xff] }
  0x1b   : > { %s2277_s16 = sshll.u32 %s282_s15, 3  ;;  %v2328_v60 = vld [vmem:[%s3362_s1 + $0x68] sm:$0xff]  ;;  %v2337_v19 = vld [vmem:[%s3364_s3 + $0x60] sm:$0xff]  ;;  %s2151_s15 = scalar_lea.sflag [#allocation5], %s3055_s22 }
  0x1c   : > { %s284_s19 = scalar_lea.vmem %s3372_s0, %s2277_s16  ;;  %v2338_v20 = vld [vmem:[%s3364_s3 + $0x68] sm:$0xff]  ;;  %s2770_s16 = scalar_lea.vmem %s3277_s29, 512 }
  0x1d   : > { %v2998_v14 = vld [vmem:[%s284_s19] sm:$0xff]  ;;  %p2771_p11 = scmp.ne.s32.totalorder %s3277_s29, %s2770_s16  ;;  %s2774_s19 = sshll.u32 %s2869_s17, 4  ;;  %s2775_s19 = int_to_ptr.vmem [resolvable:$false] %s2774_s19 }
  0x1e   : > { %2461 = vmatmul.mubr.msk.f32.vlgmr.msra.gmra.mrb[0].mxu1 %vm290_vm1, %v2998_v14  ;;  %2450 = vmatmul.mubr.msk.f32.vlgmr.msra.gmra.mrb[0].mxu0 %vm290_vm1, %v2998_v14  ;;  %p2777_p0 = scmp.lt.s32.totalorder %s3277_s29, %s2775_s19 }
  0x1f   : > { %2476 = vmatprep.mubr.msk.f32.mxu1 %vm2867_vm0, %v2868_v11  ;;  %2471 = vmatprep.mubr.msk.f32.mxu0 %vm2867_vm0, %v2868_v11  ;;  %p2772_p12 = pnand %p2771_p11, %p2951_p5 }
  0x20   : > { %2647 = vmatpush3.bf16.msra.mxu0 %v2646_v22  ;;  %v2306_v22 = vld [vmem:[%s3362_s1 + $0x40] sm:$0xff] }
  0x21   : > { %2648 = vmatprep.subr.bf16.mxu0 %v2866_v3  ;;  %p2773_p13 = pneg %p2772_p12 }
  0x24   : > { %2650 = vmatpush3.bf16.msra.mxu0 %v2649_v24  ;;  %v2670_v24 = vpack.c.bf16 %v2307_v23, %v2306_v22  ;;  %v2700_v22 = vpack.c.bf16 %v2338_v20, %v2337_v19  ;;  %v2340_v23 = vld [vmem:[%s3364_s3 + $0x78] sm:$0xff] }
  0x25   : > { %2651 = vmatprep.subr.bf16.mxu0 %v2866_v3 }
  0x27   : > { %2472 = vmatmul.mubr.msk.f32.vlgmr.msra.gmra.mrb[2].mxu0 %vm290_vm1, %v2998_v14 }
  0x28   : > { %2492 = vmatprep.mubr.msk.f32.mxu0 %vm2867_vm0, %v2868_v11  ;;  %2653 = vmatpush3.bf16.msra.mxu0 %v2652_v37 }
  0x29   : > { %2654 = vmatprep.subr.bf16.mxu0 %v2866_v3 }
  0x2c   : > { %2656 = vmatpush3.bf16.msra.mxu0 %v2655_v40  ;;  %v2317_v40 = vld [vmem:[%s3364_s3 + $0x48] sm:$0xff] }
  0x2d   : > { %2663 = vmatprep.subr.bf16.mxu0 %v2866_v3  ;;  %v2682_v42 = vpack.c.bf16 %v2317_v40, %v2316_v39 }
  0x2f   : > { %2493 = vmatmul.mubr.msk.f32.vlgmr.msra.gmra.mrb[4].mxu0 %vm290_vm1, %v2998_v14 }
  0x30   : > { %2514 = vmatprep.mubr.msk.f32.mxu0 %vm2867_vm0, %v2868_v11  ;;  %2665 = vmatpush3.bf16.msra.mxu0 %v2664_v59  ;;  %v2327_v59 = vld [vmem:[%s3362_s1 + $0x60] sm:$0xff] }
  0x31   : > { %2666 = vmatprep.subr.bf16.mxu0 %v2866_v3 }
  0x34   : > { %2668 = vmatpush3.bf16.msra.mxu0 %v2667_v61  ;;  %v2688_v61 = vpack.c.bf16 %v2328_v60, %v2327_v59 }
  0x35   : > { %2527 = vmatprep.subr.mxu0 %v2868_v11 }
  0x37   : > { %2515 = vmatmul.mubr.msk.f32.vlgmr.msra.gmra.mrb[6].mxu0 %vm290_vm1, %v2998_v14 }
  0x38   : > { %2529 = vmatprep.mubr.msk.f32.mxu0 %vm2867_vm0, %v2868_v11  ;;  %2528 = vmatpush3.msra.mxu0 %v2303_v9 }
  0x39   : > { %2669 = vmatprep.subr.bf16.mxu0 %v2866_v3 }
  0xf1   : > { %v434_v15 = vpop.f32.mrb[0].mxu1  ;;  %v360_v17 = vpop.f32.mrb[0].mxu0 }
  0xf2   : > { %v2462_v16 = vpop.f32.mrb[1].mxu1  ;;  %2475 = vmatpush3.xpose.msk.msra.mxu1 %vm512_vm2, %v434_v15  ;;  %v2451_v18 = vpop.f32.mrb[1].mxu0  ;;  %v674_v15 = vld [vmem:[%s3365_s4] sm:$0xff] }
  0xf3   : > { %2479 = vmatprep.subr.mxu1 %v2868_v11  ;;  %v2311_v16 = vld [vmem:[%s3363_s2 + $0x40] sm:$0xff] }
  0xf5   : > { %2477 = vmatmul.mubr.msk.f32.vlgmr.msra.gmra.mrb[2].mxu1 %vm512_vm2, %v360_v17  ;;  %v2312_v17 = vld [vmem:[%s3363_s2 + $0x48] sm:$0xff] }
  0xf6   : > { %2481 = vmatprep.mubr.msk.f32.mxu1 %vm2867_vm0, %v2868_v11  ;;  %v2676_v18 = vpack.c.bf16 %v2312_v17, %v2311_v16 }
  0xfa   : > { %v508_v33 = vpop.f32.mrb[2].mxu0 }
  0xfb   : > { %v2473_v34 = vpop.f32.mrb[3].mxu0  ;;  %2480 = vmatpush3.msra.mxu1 %v508_v33 }
  0xfc   : > { %2657 = vmatprep.subr.bf16.mxu1 %v2866_v3 }
 0x102   : > { %v746_v50 = vpop.f32.mrb[4].mxu0 }
 0x103   : > { %v2494_v51 = vpop.f32.mrb[5].mxu0 }
 0x10a   : > { %v896_v7 = vpop.f32.mrb[6].mxu0 }
 0x10b   : > { %v2516_v8 = vpop.f32.mrb[7].mxu0 }
 0x1c8   : > { %v585_v25 = vpop.f32.mrb[2].mxu1 }
 0x1c9   : > { %v2478_v26 = vpop.f32.mrb[3].mxu1  ;;  %v589_v27 = vsel %vm512_vm2, %v585_v25, -inf }
 0x1ca   : > { %590 = vmax.xlane.f32.xlu0 %v589_v27  ;;  %v2309_v26 = vld [vmem:[%s3362_s1 + $0x58] sm:$0xff] }
 0x257   : > { %v591_v28 = vpop.xlane.xlu0 %590 }
 0x258   : > { %v592_v29 = vsub.f32 %v585_v25, %v591_v28  ;;  %v2308_v25 = vld [vmem:[%s3362_s1 + $0x50] sm:$0xff] }
 0x25a   : > { %v593_v30 = vmul.f32 1.442695, %v592_v29  ;;  %v2673_v29 = vpack.c.bf16 %v2309_v26, %v2308_v25 }
 0x25c   : > { %2754 = vpow2.f32 %v593_v30 }
 0x266   : > { %v2755_v31 = vpop.eup %2754 }
 0x267   : > { %v595_v32 = vsel %vm512_vm2, %v2755_v31, 0.0 }
 0x268   : > { %596 = vadd.xlane.f32.xlu0 %v595_v32 }
 0x2f5   : > { %v597_v41 = vpop.xlane.xlu0 %596 }
 0x2f6   : > { %2756 = vrcp.f32 %v597_v41  ;;  %v2318_v41 = vld [vmem:[%s3364_s3 + $0x50] sm:$0xff] }
 0x300   : > { %v2757_v44 = vpop.eup %2756 }
 0x301   : > { %v599_v46 = vmul.f32 %v2757_v44, %v2755_v31  ;;  %v2685_v44 = vpack.c.bf16 %v2319_v43, %v2318_v41 }
 0x303   : > { %2482 = vmatmul.mubr.msk.f32.vlgmr.msra.gmra.mrb[4].mxu1 %vm512_vm2, %v599_v46  ;;  %600 = vst.msk [vmem:[%s3071_s18] sm:$0xff] %vm512_vm2, %v599_v46 }
 0x304   : > { %2659 = vmatpush3.bf16.msra.mxu1 %v2658_v45  ;;  %2503 = vmatprep.mubr.msk.f32.mxu1 %vm2867_vm0, %v2868_v11 }
 0x305   : > { %2660 = vmatprep.subr.bf16.mxu1 %v2866_v3 }
 0x308   : > { %2662 = vmatpush3.bf16.msra.mxu1 %v2661_v49 }
 0x309   : > { %2517 = vmatprep.subr.mxu1 %v2868_v11 }
 0x30b   : > { %2504 = vmatmul.mubr.msk.f32.vlgmr.msra.gmra.mrb[6].mxu1 %vm290_vm1, %v2998_v14 }
 0x30c   : > { %2519 = vmatprep.mubr.msk.f32.mxu1 %vm2867_vm0, %v2868_v11 }
 0x3d6   : > { %v670_v52 = vpop.f32.mrb[4].mxu1 }
 0x3d7   : > { %v2483_v53 = vpop.f32.mrb[5].mxu1 }
 0x3de   : > { %v821_v54 = vpop.f32.mrb[6].mxu1 }
 0x3df   : > { %v2505_v55 = vpop.f32.mrb[7].mxu1  ;;  %2518 = vmatpush3.xpose.msk.msra.mxu1 %vm512_vm2, %v821_v54 }
 0x3e0   : > { %2522 = vmatprep.subr.mxu1 %v2868_v11  ;;  %v2325_v55 = vld [vmem:[%s3365_s4 + $0x10] sm:$0xff] }
 0x3e2   : > { %2520 = vmatmul.mubr.msk.f32.vlgmr.msra.gmra.mrb[8].mxu1 %vm512_vm2, %v746_v50 }
 0x3e3   : > { %2524 = vmatprep.mubr.msk.f32.mxu1 %vm2867_vm0, %v2868_v11  ;;  %2523 = vmatpush3.msra.mxu1 %v896_v7 }
 0x3e4   : > { %2532 = vmatprep.subr.mxu1 %v2868_v11 }
 0x4b5   : > { %v972_v62 = vpop.f32.mrb[8].mxu1 }
 0x4b6   : > { %v2521_v63 = vpop.f32.mrb[9].mxu1  ;;  %v976_v0 = vsel %vm512_vm2, %v972_v62, -inf }
 0x4b7   : > { %977 = vmax.xlane.f32.xlu1 %v976_v0  ;;  %v2330_v63 = vld [vmem:[%s3362_s1 + $0x78] sm:$0xff] }
 0x544   : > { %v978_v1 = vpop.xlane.xlu1 %977 }
 0x545   : > { %v979_v2 = vsub.f32 %v972_v62, %v978_v1  ;;  %v2329_v62 = vld [vmem:[%s3362_s1 + $0x70] sm:$0xff]  ;;  %v2332_v1 = vld [vmem:[%s3363_s2 + $0x60] sm:$0xff] }
 0x546   : > { %v2691_v0 = vpack.c.bf16 %v2330_v63, %v2329_v62 }
 0x547   : > { %v980_v4 = vmul.f32 1.442695, %v979_v2  ;;  %v2333_v2 = vld [vmem:[%s3363_s2 + $0x68] sm:$0xff] }
 0x549   : > { %2758 = vpow2.f32 %v980_v4  ;;  %v2694_v4 = vpack.c.bf16 %v2333_v2, %v2332_v1 }
 0x553   : > { %v2759_v5 = vpop.eup %2758 }
 0x554   : > { %v982_v6 = vsel %vm512_vm2, %v2759_v5, 0.0 }
 0x555   : > { %983 = vadd.xlane.f32.xlu1 %v982_v6  ;;  %v2335_v6 = vld [vmem:[%s3363_s2 + $0x78] sm:$0xff] }
 0x5e2   : > { %v984_v10 = vpop.xlane.xlu1 %983 }
 0x5e3   : > { %2760 = vrcp.f32 %v984_v10 }
 0x5ed   : > { %v2761_v12 = vpop.eup %2760 }
 0x5ee   : > { %v986_v13 = vmul.f32 %v2761_v12, %v2759_v5  ;;  %v2334_v5 = vld [vmem:[%s3363_s2 + $0x70] sm:$0xff] }
 0x5ef   : > { %v2697_v9 = vpack.c.bf16 %v2335_v6, %v2334_v5 }
 0x5f0   : > { %2525 = vmatmul.mubr.msk.f32.vlgmr.msra.gmra.mrb[10].mxu1 %vm512_vm2, %v986_v13  ;;  %2301 = vst.msk [vmem:[%s3071_s18 + $0x8] sm:$0xff] %vm512_vm2, %v986_v13 }
 0x5f1   : > { %2533 = vmatpush3.msra.mxu1 %v674_v15  ;;  %2534 = vmatprep.mubr.msk.f32.mxu1 %vm2867_vm0, %v2868_v11 }
 0x5f2   : > { %2675 = vmatprep.subr.bf16.mxu1 %v2866_v3 }
 0x5f4   : > { %2535 = vmatmul.mubr.msk.f32.vlgmr.msra.gmra.mrb[12].mxu1 %vm512_vm2, %v670_v52 }
 0x5f5   : > { %2677 = vmatpush3.bf16.msra.mxu1 %v2676_v18  ;;  %2556 = vmatprep.mubr.msk.f32.mxu1 %vm2867_vm0, %v2868_v11 }
 0x5f6   : > { %2678 = vmatprep.subr.bf16.mxu1 %v2866_v3 }
 0x5f9   : > { %2680 = vmatpush3.bf16.msra.mxu1 %v2679_v21  ;;  %v2339_v21 = vld [vmem:[%s3364_s3 + $0x70] sm:$0xff] }
 0x5fa   : > { %2570 = vmatprep.subr.mxu1 %v2868_v11 }
 0x5fc   : > { %2557 = vmatmul.mubr.msk.f32.vlgmr.msra.gmra.mrb[14].mxu1 %vm290_vm1, %v2998_v14 }
 0x5fd   : > { %2572 = vmatprep.mubr.msk.f32.mxu1 %vm2867_vm0, %v2868_v11 }
 0x6c3   : > { %v1058_v27 = vpop.f32.mrb[10].mxu1 }
 0x6c4   : > { %v2526_v28 = vpop.f32.mrb[11].mxu1  ;;  %2530 = vmatmul.mubr.msk.f32.vlgmr.msra.gmra.mrb[8].mxu0 %vm512_vm2, %v1058_v27 }
 0x6c5   : > { %2671 = vmatpush3.bf16.msra.mxu0 %v2670_v24  ;;  %2545 = vmatprep.mubr.msk.f32.mxu0 %vm2867_vm0, %v2868_v11  ;;  %v2703_v24 = vpack.c.bf16 %v2340_v23, %v2339_v21 }
 0x6c6   : > { %2672 = vmatprep.subr.bf16.mxu0 %v2866_v3 }
 0x6c7   : > { %v1206_v30 = vpop.f32.mrb[12].mxu1 }
 0x6c8   : > { %v2536_v31 = vpop.f32.mrb[13].mxu1 }
 0x6c9   : > { %2674 = vmatpush3.bf16.msra.mxu0 %v2673_v29 }
 0x6ca   : > { %2681 = vmatprep.subr.bf16.mxu0 %v2866_v3 }
 0x6cc   : > { %2546 = vmatmul.mubr.msk.f32.vlgmr.msra.gmra.mrb[10].mxu0 %vm290_vm1, %v2998_v14 }
 0x6cd   : > { %2567 = vmatprep.mubr.msk.f32.mxu0 %vm2867_vm0, %v2868_v11  ;;  %2683 = vmatpush3.bf16.msra.mxu0 %v2682_v42 }
 0x6ce   : > { %2684 = vmatprep.subr.bf16.mxu0 %v2866_v3 }
 0x6cf   : > { %v1356_v32 = vpop.f32.mrb[14].mxu1 }
 0x6d0   : > { %v2558_v33 = vpop.f32.mrb[15].mxu1  ;;  %2571 = vmatpush3.xpose.msk.msra.mxu1 %vm512_vm2, %v1356_v32 }
 0x6d1   : > { %2575 = vmatprep.subr.mxu1 %v2868_v11  ;;  %2686 = vmatpush3.bf16.msra.mxu0 %v2685_v44 }
 0x6d2   : > { %2580 = vmatprep.subr.mxu0 %v2868_v11 }
 0x6d4   : > { %2568 = vmatmul.mubr.msk.f32.vlgmr.msra.gmra.mrb[12].mxu0 %vm290_vm1, %v2998_v14 }
 0x6d5   : > { %2582 = vmatprep.mubr.msk.f32.mxu0 %vm2867_vm0, %v2868_v11  ;;  %2581 = vmatpush3.msra.mxu0 %v2325_v55 }
 0x6d6   : > { %2693 = vmatprep.subr.bf16.mxu0 %v2866_v3 }
 0x797   : > { %v1133_v34 = vpop.f32.mrb[8].mxu0 }
 0x798   : > { %v3166_v35 = vadd.f32 %v1206_v30, %v1133_v34  ;;  %v2531_v36 = vpop.f32.mrb[9].mxu0 }
 0x79f   : > { %v1281_v37 = vpop.f32.mrb[10].mxu0 }
 0x7a0   : > { %v2547_v38 = vpop.f32.mrb[11].mxu0  ;;  %2573 = vmatmul.mubr.msk.f32.vlgmr.msra.gmra.mrb[16].mxu1 %vm512_vm2, %v1281_v37 }
 0x7a1   : > { %2577 = vmatprep.mubr.msk.f32.mxu1 %vm2867_vm0, %v2868_v11 }
 0x7a7   : > { %v1431_v53 = vpop.f32.mrb[12].mxu0 }
 0x7a8   : > { %v2569_v54 = vpop.f32.mrb[13].mxu0  ;;  %2576 = vmatpush3.msra.mxu1 %v1431_v53 }
 0x7a9   : > { %2687 = vmatprep.subr.bf16.mxu1 %v2866_v3 }
 0x873   : > { %v1507_v45 = vpop.f32.mrb[16].mxu1 }
 0x874   : > { %v2574_v46 = vpop.f32.mrb[17].mxu1  ;;  %v1511_v47 = vsel %vm512_vm2, %v1507_v45, -inf }
 0x875   : > { %1512 = vmax.xlane.f32.xlu0 %v1511_v47 }
 0x902   : > { %v1513_v48 = vpop.xlane.xlu0 %1512 }
 0x903   : > { %v1514_v49 = vsub.f32 %v1507_v45, %v1513_v48 }
 0x905   : > { %v1515_v50 = vmul.f32 1.442695, %v1514_v49 }
 0x907   : > { %2762 = vpow2.f32 %v1515_v50 }
 0x911   : > { %v2763_v51 = vpop.eup %2762 }
 0x912   : > { %v1517_v52 = vsel %vm512_vm2, %v2763_v51, 0.0 }
 0x913   : > { %1518 = vadd.xlane.f32.xlu1 %v1517_v52 }
 0x9a0   : > { %v1519_v56 = vpop.xlane.xlu1 %1518 }
 0x9a1   : > { %2764 = vrcp.f32 %v1519_v56 }
 0x9ab   : > { %v2765_v57 = vpop.eup %2764 }
 0x9ac   : > { %v1521_v58 = vmul.f32 %v2765_v57, %v2763_v51 }
 0x9ae   : > { %2578 = vmatmul.mubr.msk.f32.vlgmr.msra.gmra.mrb[18].mxu1 %vm512_vm2, %v1521_v58  ;;  %2323 = vst.msk [vmem:[%s3071_s18 + $0x10] sm:$0xff] %vm512_vm2, %v1521_v58 }
 0x9af   : > { %2593 = vmatprep.mubr.msk.f32.mxu1 %vm2867_vm0, %v2868_v11  ;;  %2689 = vmatpush3.bf16.msra.mxu1 %v2688_v61 }
 0x9b0   : > { %2690 = vmatprep.subr.bf16.mxu1 %v2866_v3 }
 0x9b3   : > { %2692 = vmatpush3.bf16.msra.mxu1 %v2691_v0 }
 0x9b4   : > { %2699 = vmatprep.subr.bf16.mxu1 %v2866_v3 }
 0x9b6   : > { %2594 = vmatmul.mubr.msk.f32.vlgmr.msra.gmra.mrb[20].mxu1 %vm290_vm1, %v2998_v14 }
 0x9b7   : > { %2615 = vmatprep.mubr.msk.f32.mxu1 %vm2867_vm0, %v2868_v11  ;;  %2701 = vmatpush3.bf16.msra.mxu1 %v2700_v22 }
 0x9b8   : > { %2702 = vmatprep.subr.bf16.mxu1 %v2866_v3 }
 0x9bb   : > { %2704 = vmatpush3.bf16.msra.mxu1 %v2703_v24 }
 0x9bc   : > { %2628 = vmatprep.subr.mxu1 %v2868_v11 }
 0x9be   : > { %2616 = vmatmul.mubr.msk.f32.vlgmr.msra.gmra.mrb[22].mxu1 %vm290_vm1, %v2998_v14 }
 0x9bf   : > { %2630 = vmatprep.mubr.msk.f32.mxu1 %vm2867_vm0, %v2868_v11 }
 0xa81   : > { %v1593_v7 = vpop.f32.mrb[18].mxu1 }
 0xa82   : > { %v2579_v8 = vpop.f32.mrb[19].mxu1  ;;  %2583 = vmatmul.mubr.msk.f32.vlgmr.msra.gmra.mrb[14].mxu0 %vm512_vm2, %v1593_v7 }
 0xa83   : > { %2695 = vmatpush3.bf16.msra.mxu0 %v2694_v4  ;;  %2604 = vmatprep.mubr.msk.f32.mxu0 %vm2867_vm0, %v2868_v11 }
 0xa84   : > { %2696 = vmatprep.subr.bf16.mxu0 %v2866_v3 }
 0xa87   : > { %2698 = vmatpush3.bf16.msra.mxu0 %v2697_v9 }
 0xa88   : > { %2618 = vmatprep.subr.mxu0 %v2868_v11 }
 0xa89   : > { %v1744_v10 = vpop.f32.mrb[20].mxu1 }
 0xa8a   : > { %2605 = vmatmul.mubr.msk.f32.vlgmr.msra.gmra.mrb[16].mxu0 %vm290_vm1, %v2998_v14  ;;  %v2595_v12 = vpop.f32.mrb[21].mxu1 }
 0xa8b   : > { %2620 = vmatprep.mubr.msk.f32.mxu0 %vm2867_vm0, %v2868_v11 }
 0xa91   : > { %v1894_v14 = vpop.f32.mrb[22].mxu1 }
 0xa92   : > { %v2617_v32 = vpop.f32.mrb[23].mxu1 }
 0xb55   : > { %v1668_v13 = vpop.f32.mrb[14].mxu0 }
 0xb56   : > { %v3241_v15 = vadd.f32 %v1668_v13, %v3166_v35  ;;  %v2584_v16 = vpop.f32.mrb[15].mxu0 }
 0xb5d   : > { %v1819_v17 = vpop.f32.mrb[16].mxu0 }
 0xb5e   : > { %v2606_v18 = vpop.f32.mrb[17].mxu0  ;;  %2619 = vmatpush3.xpose.msk.msra.mxu0 %vm512_vm2, %v1819_v17 }
 0xb5f   : > { %2623 = vmatprep.subr.mxu0 %v2868_v11 }
 0xb61   : > { %2621 = vmatmul.mubr.msk.f32.vlgmr.msra.gmra.mrb[18].mxu0 %vm512_vm2, %v1744_v10 }
 0xb62   : > { %2625 = vmatprep.mubr.msk.f32.mxu0 %vm2867_vm0, %v2868_v11  ;;  %2624 = vmatpush3.msra.mxu0 %v1894_v14  ;;  %v2346_v11 = vld [vmem:[%s3365_s4 + $0x18] sm:$0xff] }
 0xb63   : > { %2629 = vmatpush3.msra.mxu1 %v2346_v11 }
 0xc34   : > { %v1970_v25 = vpop.f32.mrb[18].mxu0 }
 0xc35   : > { %v2622_v26 = vpop.f32.mrb[19].mxu0  ;;  %v1974_v27 = vsel %vm512_vm2, %v1970_v25, -inf }
 0xc36   : > { %1975 = vmax.xlane.f32.xlu0 %v1974_v27 }
 0xcc3   : > { %v1976_v28 = vpop.xlane.xlu0 %1975 }
 0xcc4   : > { %v1977_v29 = vsub.f32 %v1970_v25, %v1976_v28 }
 0xcc6   : > { %v1978_v30 = vmul.f32 1.442695, %v1977_v29 }
 0xcc8   : > { %2766 = vpow2.f32 %v1978_v30 }
 0xcd2   : > { %v2767_v3 = vpop.eup %2766 }
 0xcd3   : > { %v1980_v31 = vsel %vm512_vm2, %v2767_v3, 0.0 }
 0xcd4   : > { %1981 = vadd.xlane.f32.xlu1 %v1980_v31 }
 0xd61   : > { %v1982_v33 = vpop.xlane.xlu1 %1981 }
 0xd62   : > { %2768 = vrcp.f32 %v1982_v33 }
 0xd6c   : > { %v2769_v34 = vpop.eup %2768 }
 0xd6d   : > { %v1984_v35 = vmul.f32 %v2769_v34, %v2767_v3 }
 0xd6f   : > { %2626 = vmatmul.mubr.msk.f32.vlgmr.msra.gmra.mrb[20].mxu0 %vm512_vm2, %v1984_v35  ;;  %2344 = vst.msk [vmem:[%s3071_s18 + $0x18] sm:$0xff] %vm512_vm2, %v1984_v35  ;;  %s2776_s18 = scalar_lea.vmem %s2775_s19, 1024 }
 0xd70   : > { %p2778_p1 = scmp.lt.s32.totalorder %s2776_s18, %s2770_s16 }
 0xd72   : > { %p2779_p2 = por %p2778_p1, %p2777_p0 }
 0xd74   : > { %p2780_p3 = pnand %p2779_p2, %p2773_p13 }
 0xe42   : > { %v2056_v36 = vpop.f32.mrb[20].mxu0 }
 0xe43   : > { %v2627_v37 = vpop.f32.mrb[21].mxu0  ;;  %2631 = vmatmul.mubr.msk.f32.vlgmr.msra.gmra.mrb[24].mxu1 %vm512_vm2, %v2056_v36 }
 0xe44   : > { %2783 = shalt.err (!%p2780_p3)
}
 0xe45   : > { %s2784_s20 = scalar_lea.hbm %s3282_s14, 512  ;;  %s2788_s8 = scalar_lea.hbm %s3368_s7, 1024 }
 0xe46   : > { %p2785_p4 = scmp.ne.s32.totalorder %s3282_s14, %s2784_s20  ;;  %p2789_p9 = scmp.lt.u32.totalorder %s3282_s14, %s3368_s7 }
 0xe47   : > { %p2790_p10 = scmp.lt.u32.totalorder %s2788_s8, %s2784_s20  ;;  %p2792_p12 = scmp.lt.u32.totalorder %s2784_s20, %s3282_s14 }
 0xe48   : > { %p2786_p7 = pnand %p2785_p4, %p2951_p5 }
 0xe49   : > { %p2791_p11 = por %p2790_p10, %p2789_p9 }
 0xe4a   : > { %p2787_p8 = pneg %p2786_p7 }
 0xe4b   : > { %p2793_p13 = por %p2792_p12, %p2791_p11 }
 0xe4d   : > { %p2794_p0 = pnand %p2793_p13, %p2787_p8 }
 0xe4f   : > { %2797 = shalt.err (!%p2794_p0)
}
 0xe50   : > { %s2870_s16 = smov 128   ;;  %s2871_s17 = smov 8   ;;  %v2348_v39 = vld [vmem:[%s3366_s5] ss:$0 sm:$0xff] }
 0xe51   : > { %2706 = dma.vmem_to_hbm [thread:$0]  (%p2951_p5), %s3277_s29, 512, %s3282_s14, %s2151_s15, %s2870_s16, %s2870_s16, %s2871_s17  }
 0xe52   : > { %s2275_s19 = sshll.u32 %s3055_s22, 3  ;;  %s2351_s21 = sshll.u32 %s2934_s28, 7 }
 0xe53   : > { %s273_s23 = scalar_lea.vmem [#allocation2], %s2275_s19  ;;  %s3317_s0 = scalar_lea.hbm %s3367_s6, %s2351_s21 }
 0xe54   : > { %s2164_s8 = sshll.u32 %s273_s23, 4  ;;  %s2146_s29 = scalar_lea.sflag [#allocation3], %s3055_s22  ;;  %s3319_s8 = int_to_ptr.vmem [resolvable:$true] %s2164_s8 }
 0xe55   : > { %s2798_s28 = scalar_lea.vmem %s3319_s8, 128  ;;  %s2872_s14 = smov [#allocation2]  }
 0xe56   : > { %p2799_p1 = scmp.ne.s32.totalorder %s3319_s8, %s2798_s28  ;;  %s2802_s15 = sshll.u32 %s2872_s14, 4  ;;  %s2803_s15 = int_to_ptr.vmem [resolvable:$false] %s2802_s15 }
 0xe57   : > { %s2804_s16 = scalar_lea.vmem %s2803_s15, 256  ;;  %p2805_p4 = scmp.lt.s32.totalorder %s3319_s8, %s2803_s15 }
 0xe58   : > { %p2800_p2 = pnand %p2799_p1, %p2951_p5  ;;  %p2806_p7 = scmp.lt.s32.totalorder %s2804_s16, %s2798_s28 }
 0xe5a   : > { %p2801_p3 = pneg %p2800_p2  ;;  %p2807_p8 = por %p2806_p7, %p2805_p4 }
 0xe5c   : > { %p2808_p9 = pnand %p2807_p8, %p2801_p3 }
 0xf16   : > { %v2131_v38 = vpop.f32.mrb[24].mxu1 }
 0xf17   : > { %v2135_v40 = vadd.f32 %v2131_v38, %v3241_v15  ;;  %v2632_v41 = vpop.f32.mrb[25].mxu1 }
 0xf19   : > { %v2143_v42 = vadd.f32 %v2348_v39, %v2135_v40 }
 0xf1b   : > { %2144 = vst.msk [vmem:[%s273_s23] sm:$0xff] %vm290_vm1, %v2143_v42 }
 0xf1c   : > { %2811 = shalt.err (!%p2808_p9)
}
 0xf1d   : > { %s2812_s22 = scalar_lea.hbm %s3317_s0, 128  ;;  %s2816_s18 = scalar_lea.hbm %s3367_s6, 256 }
 0xf1e   : > { %p2813_p10 = scmp.ne.s32.totalorder %s3317_s0, %s2812_s22  ;;  %p2817_p13 = scmp.lt.u32.totalorder %s3317_s0, %s3367_s6 }
 0xf1f   : > { %p2818_p0 = scmp.lt.u32.totalorder %s2816_s18, %s2812_s22  ;;  %p2820_p2 = scmp.lt.u32.totalorder %s2812_s22, %s3317_s0 }
 0xf20   : > { %p2814_p11 = pnand %p2813_p10, %p2951_p5 }
 0xf21   : > { %p2819_p1 = por %p2818_p0, %p2817_p13 }
 0xf22   : > { %p2815_p12 = pneg %p2814_p11 }
 0xf23   : > { %p2821_p3 = por %p2820_p2, %p2819_p1 }
 0xf25   : > { %p2822_p4 = pnand %p2821_p3, %p2815_p12 }
 0xf27   : > { %2825 = shalt.err (!%p2822_p4)
}
 0xf28   : > { %2705 = dma.vmem_to_hbm [thread:$0]  (%p2951_p5), %s3319_s8, 128, %s3317_s0, %s2146_s29  }
 0xf29 PF: > { %p2716_p7 = scmp.ge.s32.totalorder %s2864_s27, 2  ;;  %s2192_s23 = sand.u32 1, %s2852_s24  }
 0xf2a   : > { %s2193_s9 = scalar_lea.sflag [#allocation3], %s2192_s23 }
 0xf2b   : > { %p2710_p8 = pnand %p2716_p7, %p2955_p6 }
 0xf2d   : > { %2843 = dma.done.wait (!%p2710_p8), %s2193_s9, 128  }
 0xf2e   : > { %2845 = vsyncadd (!%p2710_p8), %s2193_s9, 4294967168  ;;  %s2202_s13 = scalar_lea.sflag [#allocation5], %s2192_s23 }
 0xf2f   : > { %2847 = dma.done.wait (!%p2710_p8), %s2202_s13, 512  }
 0xf30   : > { %2849 = vsyncadd (!%p2710_p8), %s2202_s13, 4294966784  ;;  %p21_p5 = scmp.ge.s32.totalorder %s2938_s30, 4   ;;  %s3373_s24 = smov %s2856_s25 }
 0xf31   : > { %s3374_s25 = smov %s2860_s26  ;;  %s3375_s26 = smov %s2949_s10 }
 0xf32   : > { %s3376_s27 = smov %s2938_s30  ;;  %23 = sbr.rel (!%p21_p5) target bundleno = 7 (0x7), region = 111 }
 0xf39   :  { %2207 = vsyncpa [#allocation3], 1 }
 0xf3a   :  { %2209 = vsyncpa [#allocation3 + $0x1], 1 }
 0xf3b   :  { %2210 = vsyncpa [#allocation5], 1 }
 0xf3c   :  { %2212 = vsyncpa [#allocation5 + $0x1], 1 }

</bundles_post_ra>
